<compile_context>
chip_gen: v6e
topology: v6e:2x2x1
jax: 0.10.0
libtpu: 0.0.40
codegen_flags: <defaults>
</compile_context>

<pallas_src>
import functools

import jax
import jax.numpy as jnp
from jax import lax
from jax.experimental import pallas as pl
from jax.experimental.pallas import tpu as pltpu


def _round_up(x, m):
    return ((x + m - 1) // m) * m


def _vmem_capacity_bytes(default_bytes=64 << 20):
    """Generation-aware VMEM capacity (falls back to v7x's 64 MiB per TC)."""
    try:
        info = pltpu.get_tpu_info()
        cap = int(getattr(info, "vmem_capacity_bytes", default_bytes))
        return cap if cap > 0 else default_bytes
    except Exception:
        return default_bytes


def _counts_kernel(x_ref, out_ref, carry_ref, *, total_rows, rows_per_split,
                   block_rows, mxu_dtype, approx_reciprocal):
    """Accumulate partial transition counts for one split of the sequence.

    out_ref   : (C, C) f32 partial counts, resident across the t axis.
    carry_ref : (1, C) f32 softmax of the last row of the previous block.
    """
    s = pl.program_id(0)        # split index ("parallel"/CORE_PARALLEL axis)
    t = pl.program_id(1)        # T-block index within the split ("arbitrary")

    @pl.when(t == 0)
    def _():
        out_ref[...] = jnp.zeros_like(out_ref)
        carry_ref[...] = jnp.zeros_like(carry_ref)

    # Scalar bookkeeping only (sreg/SMEM path).
    limit = jnp.minimum(rows_per_split, total_rows - s * rows_per_split)
    is_full = (t + 1) * block_rows <= limit   # is every row of this block valid?

    def softmax_f32(x):
        # f32 VPU math (v5e-friendly); softmax denominator on the EUP.
        m = jnp.max(x, axis=1, keepdims=True)
        e = jnp.exp(x - m)
        denom = jnp.sum(e, axis=1, keepdims=True)
        return e * pl.reciprocal(denom, approx=approx_reciprocal)

    def accumulate(y):
        # prev[r] = y[r-1]; row 0 wraps to y[tb-1] (fixed by the rank-1 term
        # below instead of a full-block broadcast+select).  roll is an XLU op,
        # keeps 8-sublane alignment, no misaligned [:T-1]/[1:] slices.
        prev = pltpu.roll(y, shift=1, axis=0)
        y_first = y[0:1, :]
        y_last = y[block_rows - 1:block_rows, :]

        # counts[i, j] += sum_r prev[r, i] * y[r, j]  (contract over time; dim-0
        # contraction maps to the MXU transposed-LHS path, f32 accumulation).
        main = lax.dot_general(
            prev.astype(mxu_dtype), y.astype(mxu_dtype),
            dimension_numbers=(((0,), (0,)), ((), ())),
            preferred_element_type=jnp.float32)
        # Rank-1 fix for the wrapped row 0: swap y_last's contribution for the
        # carried last row of the previous block (carry == 0 at t == 0, so the
        # split-boundary pair is added in the wrapper epilogue instead).
        corr = lax.dot_general(
            (carry_ref[...] - y_last).astype(mxu_dtype),
            y_first.astype(mxu_dtype),
            dimension_numbers=(((0,), (0,)), ((), ())),
            preferred_element_type=jnp.float32)

        out_ref[...] += main + corr
        carry_ref[...] = y_last

    # Fast path: full block, no masking work at all (the common case).
    @pl.when(is_full)
    def _():
        accumulate(softmax_f32(x_ref[...].astype(jnp.float32)))

    # Tail path: mask rows past the end of this split / past T (also scrubs the
    # undefined VMEM contents of a partial edge block before the softmax).
    @pl.when(jnp.logical_not(is_full))
    def _():
        x = x_ref[...].astype(jnp.float32)
        row = lax.broadcasted_iota(jnp.int32, (block_rows, 1), 0)
        valid = row < (limit - t * block_rows)            # (TB, 1)
        x = jnp.where(valid, x, 0.0)
        y = jnp.where(valid, softmax_f32(x), 0.0)         # padded rows -> 0
        accumulate(y)


def sequence_loss(x, A, *, block_rows=1024, num_splits=1,
                  mxu_dtype=jnp.bfloat16, approx_reciprocal=True,
                  input_buffers=2, core_parallel_splits=False):
    """x: (T, C) logits (f32 or bf16), A: (C, C) positive transition matrix.

    Returns the scalar loss -sum(counts * log(A)) with counts as in the
    PyTorch SequenceLoss module.  Set mxu_dtype=jnp.float32 and
    approx_reciprocal=False for a tighter-accuracy path.  On v7x, use
    num_splits=2 (multiple of 2) with core_parallel_splits=True; keep
    num_splits=1 on v5e/v6e (single TensorCore).
    """
    T, C = x.shape

    tb = min(_round_up(block_rows, 8), _round_up(T, 8))
    blocks_total = pl.cdiv(T, tb)
    splits = max(1, min(num_splits, blocks_total))
    blocks_per_split = pl.cdiv(blocks_total, splits)
    rows_per_split = blocks_per_split * tb

    # Clamp the block index only if some (split, t) pair would run past the
    # array (the clamped block's rows are fully masked in-kernel).
    if splits * blocks_per_split > blocks_total:
        x_map = lambda s, t: (jnp.minimum(s * blocks_per_split + t,
                                          blocks_total - 1), 0)
    else:
        x_map = lambda s, t: (s * blocks_per_split + t, 0)

    kernel = functools.partial(
        _counts_kernel, total_rows=T, rows_per_split=rows_per_split,
        block_rows=tb, mxu_dtype=mxu_dtype,
        approx_reciprocal=approx_reciprocal)

    itemsize = jnp.dtype(x.dtype).itemsize
    n_buf = max(2, int(input_buffers))
    vmem_needed = (n_buf * tb * C * itemsize      # pipelined input buffers
                   + 2 * C * C * 4                # resident (C, C) accumulator
                   + 32 * C * 4)                  # carry + headroom
    vmem_cap = _vmem_capacity_bytes()
    vmem_limit = int(min(max(2 * vmem_needed, 4 << 20), (3 * vmem_cap) // 4))

    cost = pl.CostEstimate(
        flops=2 * T * C * C + 8 * T * C,
        transcendentals=T * C,
        bytes_accessed=T * C * itemsize + splits * C * C * 4,
    )

    in_spec_kwargs = {}
    if n_buf > 2:
        # Sweepable: a 3rd input buffer hides DMA jitter once compute shrinks.
        in_spec_kwargs["pipeline_mode"] = pl.Buffered(n_buf)
    in_spec = pl.BlockSpec((tb, C), x_map, **in_spec_kwargs)

    if core_parallel_splits:
        # v7x: shard the split axis across the 2 TensorCores.  The t axis MUST
        # stay ARBITRARY (carry_ref / resident accumulator are sequential).
        dim_sems = (pltpu.CORE_PARALLEL, pltpu.ARBITRARY)
    else:
        dim_sems = ("parallel", "arbitrary")

    partial_counts = pl.pallas_call(
        kernel,
        out_shape=jax.ShapeDtypeStruct((splits, C, C), jnp.float32),
        grid_spec=pltpu.PrefetchScalarGridSpec(
            num_scalar_prefetch=0,
            grid=(splits, blocks_per_split),
            in_specs=[in_spec],
            out_specs=pl.BlockSpec((None, C, C), lambda s, t: (s, 0, 0)),
            scratch_shapes=[pltpu.VMEM((1, C), jnp.float32)],
        ),
        compiler_params=pltpu.CompilerParams(
            dimension_semantics=dim_sems,
            vmem_limit_bytes=vmem_limit,
        ),
        cost_estimate=cost,
    )(x)

    counts = jnp.sum(partial_counts, axis=0)

    # Pairs straddling a split boundary are added here (tiny XLA epilogue).
    for s in range(1, splits):
        b = s * rows_per_split
        if b < T:
            prev_row = jax.nn.softmax(x[b - 1].astype(jnp.float32))
            next_row = jax.nn.softmax(x[b].astype(jnp.float32))
            counts = counts + jnp.outer(prev_row, next_row)

    # log(A) and the /T fold into a single scalar epilogue (matches PyTorch:
    # divide by T = input.shape[0], no epsilon on log(A)).
    return -jnp.sum(counts * jnp.log(A.astype(jnp.float32))) / T


def sequence_loss_ref(x, A):
    """Pure-JAX reference mirroring the PyTorch module."""
    T = x.shape[0]
    y = jax.nn.softmax(x.astype(jnp.float32), axis=1)
    counts = (y[:T - 1].T @ y[1:]) / T
    return -jnp.sum(counts * jnp.log(A.astype(jnp.float32)))


if __name__ == "__main__":
    key = jax.random.PRNGKey(0)
    k1, k2, k3, k4 = jax.random.split(key, 4)

    # Small shape matching the module: (T, C) logits + (C, C) transition matrix.
    T, C = 8, 4
    x = jax.random.normal(k1, (T, C), dtype=jnp.float32)
    A = jax.random.uniform(k2, (C, C), dtype=jnp.float32, minval=0.1, maxval=1.0)

    loss = sequence_loss(x, A)
    jax.block_until_ready(loss)
    ref = sequence_loss_ref(x, A)
    assert jnp.allclose(loss, ref, rtol=2e-2, atol=2e-2), (loss, ref)

    # Larger, lane-dense shape exercising the fast path, the masked tail path
    # (T not a multiple of the block), the carry, and the 2-split epilogue.
    T2, C2 = 1000, 128
    x2 = jax.random.normal(k3, (T2, C2), dtype=jnp.float32)
    A2 = jax.random.uniform(k4, (C2, C2), dtype=jnp.float32,
                            minval=0.1, maxval=1.0)

    loss2 = sequence_loss(x2, A2, block_rows=256, num_splits=2)
    jax.block_until_ready(loss2)
    ref2 = sequence_loss_ref(x2, A2)
    assert jnp.allclose(loss2, ref2, rtol=2e-2, atol=2e-2), (loss2, ref2)

    print("KERNEL_OK")
</pallas_src>

<mosaic_0001>
module attributes {stable_mosaic.version = 11 : i64} {
  func.func @_counts_kernel(%arg0: i32, %arg1: i32, %arg2: memref<8x4xf32, #tpu.memory_space<vmem>>, %arg3: memref<1x4x4xf32, #tpu.memory_space<vmem>>, %arg4: memref<1x4xf32, #tpu.memory_space<vmem>>) attributes {dimension_semantics = [#tpu.dimension_semantics<parallel>, #tpu.dimension_semantics<arbitrary>], iteration_bounds = array<i64: 1, 1>, scalar_prefetch = 0 : i64, scratch_operands = 1 : i64, tpu.core_type = #tpu.core_type<tc>, window_params = [{transform_indices = @transform_0, window_bounds = array<i64: 8, 4>}, {transform_indices = @transform_1, window_bounds = array<i64: 1, 4, 4>}]} {
    %c0_i32 = arith.constant 0 : i32
    %0 = arith.cmpi eq, %arg1, %c0_i32 : i32
    %1 = arith.extui %0 : i1 to i32
    %c0_i32_0 = arith.constant 0 : i32
    %2 = arith.cmpi ne, %1, %c0_i32_0 : i32
    scf.if %2 {
      %cst = arith.constant 0.000000e+00 : f32
      %14 = vector.broadcast %cst : f32 to vector<4x4xf32>
      %c0 = arith.constant 0 : index
      %c0_6 = arith.constant 0 : index
      %c0_7 = arith.constant 0 : index
      %15 = vector.load %arg3[%c0, %c0_6, %c0_7] : memref<1x4x4xf32, #tpu.memory_space<vmem>>, vector<1x4x4xf32>
      %16 = vector.shape_cast %15 : vector<1x4x4xf32> to vector<4x4xf32>
      %17 = vector.shape_cast %14 : vector<4x4xf32> to vector<1x4x4xf32>
      tpu.vector_store %arg3[%c0, %c0_6, %c0_7], %17 {strides = array<i32>} : memref<1x4x4xf32, #tpu.memory_space<vmem>>, vector<1x4x4xf32>,
      %cst_8 = arith.constant 0.000000e+00 : f32
      %18 = vector.broadcast %cst_8 : f32 to vector<1x4xf32>
      %c0_9 = arith.constant 0 : index
      %c0_10 = arith.constant 0 : index
      %19 = vector.load %arg4[%c0_9, %c0_10] : memref<1x4xf32, #tpu.memory_space<vmem>>, vector<1x4xf32>
      tpu.vector_store %arg4[%c0_9, %c0_10], %18 {strides = array<i32>} : memref<1x4xf32, #tpu.memory_space<vmem>>, vector<1x4xf32>,
    } else {
    }
    %c8_i32 = arith.constant 8 : i32
    %3 = arith.muli %arg0, %c8_i32 : i32
    %c8_i32_1 = arith.constant 8 : i32
    %4 = arith.subi %c8_i32_1, %3 : i32
    %c8_i32_2 = arith.constant 8 : i32
    %5 = arith.minsi %c8_i32_2, %4 : i32
    %c1_i32 = arith.constant 1 : i32
    %6 = arith.addi %arg1, %c1_i32 : i32
    %c8_i32_3 = arith.constant 8 : i32
    %7 = arith.muli %6, %c8_i32_3 : i32
    %8 = arith.cmpi sle, %7, %5 : i32
    %9 = arith.extui %8 : i1 to i32
    %c0_i32_4 = arith.constant 0 : i32
    %10 = arith.cmpi ne, %9, %c0_i32_4 : i32
    scf.if %10 {
      %c0 = arith.constant 0 : index
      %c0_6 = arith.constant 0 : index
      %14 = vector.load %arg2[%c0, %c0_6] : memref<8x4xf32, #tpu.memory_space<vmem>>, vector<8x4xf32>
      %cst = arith.constant dense<0xFF800000> : vector<8xf32>
      %15 = vector.multi_reduction <maximumf>, %14, %cst [1] : vector<8x4xf32> to vector<8xf32>
      %16 = vector.shape_cast %15 : vector<8xf32> to vector<8x1xf32>
      %17 = vector.broadcast %16 : vector<8x1xf32> to vector<8x4xf32>
      %18 = arith.subf %14, %17 : vector<8x4xf32>
      %19 = math.exp %18 : vector<8x4xf32>
      %cst_7 = arith.constant dense<0.000000e+00> : vector<8xf32>
      %20 = vector.multi_reduction <add>, %19, %cst_7 [1] : vector<8x4xf32> to vector<8xf32>
      %21 = vector.shape_cast %20 : vector<8xf32> to vector<8x1xf32>
      %22 = tpu.reciprocal %21 {approx = true} : vector<8x1xf32> -> vector<8x1xf32>
      %23 = vector.broadcast %22 : vector<8x1xf32> to vector<8x4xf32>
      %24 = arith.mulf %19, %23 : vector<8x4xf32>
      %c1_i32_8 = arith.constant 1 : i32
      %25 = tpu.dynamic_rotate %24 by %c1_i32_8 dim 0 : vector<8x4xf32>, i32 -> vector<8x4xf32>
      %26 = vector.extract_strided_slice %24 {offsets = [0, 0], sizes = [1, 4], strides = [1, 1]} : vector<8x4xf32> to vector<1x4xf32>
      %27 = vector.extract_strided_slice %24 {offsets = [7, 0], sizes = [1, 4], strides = [1, 1]} : vector<8x4xf32> to vector<1x4xf32>
      %28 = arith.truncf %25 : vector<8x4xf32> to vector<8x4xbf16>
      %29 = arith.truncf %24 : vector<8x4xf32> to vector<8x4xbf16>
      %cst_9 = arith.constant dense<0.000000e+00> : vector<4x4xf32>
      %30 = tpu.matmul %28, %29, %cst_9 {dimension_numbers = #tpu.dot_dimension_numbers<[0], [0], [1], [1], [0, 1, 1, 1], [], []>} : vector<8x4xbf16>, vector<8x4xbf16>, vector<4x4xf32> -> vector<4x4xf32>
      %c0_10 = arith.constant 0 : index
      %c0_11 = arith.constant 0 : index
      %31 = vector.load %arg4[%c0_10, %c0_11] : memref<1x4xf32, #tpu.memory_space<vmem>>, vector<1x4xf32>
      %32 = arith.subf %31, %27 : vector<1x4xf32>
      %33 = arith.truncf %32 : vector<1x4xf32> to vector<1x4xbf16>
      %34 = arith.truncf %26 : vector<1x4xf32> to vector<1x4xbf16>
      %cst_12 = arith.constant dense<0.000000e+00> : vector<4x4xf32>
      %35 = tpu.matmul %33, %34, %cst_12 {dimension_numbers = #tpu.dot_dimension_numbers<[0], [0], [1], [1], [0, 1, 1, 1], [], []>} : vector<1x4xbf16>, vector<1x4xbf16>, vector<4x4xf32> -> vector<4x4xf32>
      %c0_13 = arith.constant 0 : index
      %c0_14 = arith.constant 0 : index
      %c0_15 = arith.constant 0 : index
      %36 = vector.load %arg3[%c0_13, %c0_14, %c0_15] : memref<1x4x4xf32, #tpu.memory_space<vmem>>, vector<1x4x4xf32>
      %37 = vector.shape_cast %36 : vector<1x4x4xf32> to vector<4x4xf32>
      %38 = arith.addf %30, %35 : vector<4x4xf32>
      %39 = arith.addf %37, %38 : vector<4x4xf32>
      %c0_16 = arith.constant 0 : index
      %c0_17 = arith.constant 0 : index
      %c0_18 = arith.constant 0 : index
      %40 = vector.load %arg3[%c0_16, %c0_17, %c0_18] : memref<1x4x4xf32, #tpu.memory_space<vmem>>, vector<1x4x4xf32>
      %41 = vector.shape_cast %40 : vector<1x4x4xf32> to vector<4x4xf32>
      %42 = vector.shape_cast %39 : vector<4x4xf32> to vector<1x4x4xf32>
      tpu.vector_store %arg3[%c0_16, %c0_17, %c0_18], %42 {strides = array<i32>} : memref<1x4x4xf32, #tpu.memory_space<vmem>>, vector<1x4x4xf32>,
      %c0_19 = arith.constant 0 : index
      %c0_20 = arith.constant 0 : index
      %43 = vector.load %arg4[%c0_19, %c0_20] : memref<1x4xf32, #tpu.memory_space<vmem>>, vector<1x4xf32>
      tpu.vector_store %arg4[%c0_19, %c0_20], %27 {strides = array<i32>} : memref<1x4xf32, #tpu.memory_space<vmem>>, vector<1x4xf32>,
    } else {
    }
    %true = arith.constant true
    %11 = arith.xori %8, %true : i1
    %12 = arith.extui %11 : i1 to i32
    %c0_i32_5 = arith.constant 0 : i32
    %13 = arith.cmpi ne, %12, %c0_i32_5 : i32
    scf.if %13 {
      %c0 = arith.constant 0 : index
      %c0_6 = arith.constant 0 : index
      %14 = vector.load %arg2[%c0, %c0_6] : memref<8x4xf32, #tpu.memory_space<vmem>>, vector<8x4xf32>
      %15 = tpu.iota {dimensions = array<i32: 0>} : vector<8x1xi32>
      %c8_i32_7 = arith.constant 8 : i32
      %16 = arith.muli %arg1, %c8_i32_7 : i32
      %17 = arith.subi %5, %16 : i32
      %18 = vector.broadcast %17 : i32 to vector<8x1xi32>
      %19 = arith.cmpi slt, %15, %18 : vector<8x1xi32>
      %cst = arith.constant 0.000000e+00 : f32
      %20 = vector.shape_cast %19 : vector<8x1xi1> to vector<8x1xi1>
      %21 = vector.broadcast %20 : vector<8x1xi1> to vector<8x4xi1>
      %22 = vector.broadcast %cst : f32 to vector<8x4xf32>
      %23 = arith.select %21, %14, %22 : vector<8x4xi1>, vector<8x4xf32>
      %cst_8 = arith.constant dense<0xFF800000> : vector<8xf32>
      %24 = vector.multi_reduction <maximumf>, %23, %cst_8 [1] : vector<8x4xf32> to vector<8xf32>
      %25 = vector.shape_cast %24 : vector<8xf32> to vector<8x1xf32>
      %26 = vector.broadcast %25 : vector<8x1xf32> to vector<8x4xf32>
      %27 = arith.subf %23, %26 : vector<8x4xf32>
      %28 = math.exp %27 : vector<8x4xf32>
      %cst_9 = arith.constant dense<0.000000e+00> : vector<8xf32>
      %29 = vector.multi_reduction <add>, %28, %cst_9 [1] : vector<8x4xf32> to vector<8xf32>
      %30 = vector.shape_cast %29 : vector<8xf32> to vector<8x1xf32>
      %31 = tpu.reciprocal %30 {approx = true} : vector<8x1xf32> -> vector<8x1xf32>
      %32 = vector.broadcast %31 : vector<8x1xf32> to vector<8x4xf32>
      %33 = arith.mulf %28, %32 : vector<8x4xf32>
      %cst_10 = arith.constant 0.000000e+00 : f32
      %34 = vector.shape_cast %19 : vector<8x1xi1> to vector<8x1xi1>
      %35 = vector.broadcast %34 : vector<8x1xi1> to vector<8x4xi1>
      %36 = vector.broadcast %cst_10 : f32 to vector<8x4xf32>
      %37 = arith.select %35, %33, %36 : vector<8x4xi1>, vector<8x4xf32>
      %c1_i32_11 = arith.constant 1 : i32
      %38 = tpu.dynamic_rotate %37 by %c1_i32_11 dim 0 : vector<8x4xf32>, i32 -> vector<8x4xf32>
      %39 = vector.extract_strided_slice %37 {offsets = [0, 0], sizes = [1, 4], strides = [1, 1]} : vector<8x4xf32> to vector<1x4xf32>
      %40 = vector.extract_strided_slice %37 {offsets = [7, 0], sizes = [1, 4], strides = [1, 1]} : vector<8x4xf32> to vector<1x4xf32>
      %41 = arith.truncf %38 : vector<8x4xf32> to vector<8x4xbf16>
      %42 = arith.truncf %37 : vector<8x4xf32> to vector<8x4xbf16>
      %cst_12 = arith.constant dense<0.000000e+00> : vector<4x4xf32>
      %43 = tpu.matmul %41, %42, %cst_12 {dimension_numbers = #tpu.dot_dimension_numbers<[0], [0], [1], [1], [0, 1, 1, 1], [], []>} : vector<8x4xbf16>, vector<8x4xbf16>, vector<4x4xf32> -> vector<4x4xf32>
      %c0_13 = arith.constant 0 : index
      %c0_14 = arith.constant 0 : index
      %44 = vector.load %arg4[%c0_13, %c0_14] : memref<1x4xf32, #tpu.memory_space<vmem>>, vector<1x4xf32>
      %45 = arith.subf %44, %40 : vector<1x4xf32>
      %46 = arith.truncf %45 : vector<1x4xf32> to vector<1x4xbf16>
      %47 = arith.truncf %39 : vector<1x4xf32> to vector<1x4xbf16>
      %cst_15 = arith.constant dense<0.000000e+00> : vector<4x4xf32>
      %48 = tpu.matmul %46, %47, %cst_15 {dimension_numbers = #tpu.dot_dimension_numbers<[0], [0], [1], [1], [0, 1, 1, 1], [], []>} : vector<1x4xbf16>, vector<1x4xbf16>, vector<4x4xf32> -> vector<4x4xf32>
      %c0_16 = arith.constant 0 : index
      %c0_17 = arith.constant 0 : index
      %c0_18 = arith.constant 0 : index
      %49 = vector.load %arg3[%c0_16, %c0_17, %c0_18] : memref<1x4x4xf32, #tpu.memory_space<vmem>>, vector<1x4x4xf32>
      %50 = vector.shape_cast %49 : vector<1x4x4xf32> to vector<4x4xf32>
      %51 = arith.addf %43, %48 : vector<4x4xf32>
      %52 = arith.addf %50, %51 : vector<4x4xf32>
      %c0_19 = arith.constant 0 : index
      %c0_20 = arith.constant 0 : index
      %c0_21 = arith.constant 0 : index
      %53 = vector.load %arg3[%c0_19, %c0_20, %c0_21] : memref<1x4x4xf32, #tpu.memory_space<vmem>>, vector<1x4x4xf32>
      %54 = vector.shape_cast %53 : vector<1x4x4xf32> to vector<4x4xf32>
      %55 = vector.shape_cast %52 : vector<4x4xf32> to vector<1x4x4xf32>
      tpu.vector_store %arg3[%c0_19, %c0_20, %c0_21], %55 {strides = array<i32>} : memref<1x4x4xf32, #tpu.memory_space<vmem>>, vector<1x4x4xf32>,
      %c0_22 = arith.constant 0 : index
      %c0_23 = arith.constant 0 : index
      %56 = vector.load %arg4[%c0_22, %c0_23] : memref<1x4xf32, #tpu.memory_space<vmem>>, vector<1x4xf32>
      tpu.vector_store %arg4[%c0_22, %c0_23], %40 {strides = array<i32>} : memref<1x4xf32, #tpu.memory_space<vmem>>, vector<1x4xf32>,
    } else {
    }
    return
  }
  func.func @transform_0(%arg0: i32, %arg1: i32) -> (i32, i32) {
    %c1_i32 = arith.constant 1 : i32
    %0 = arith.muli %arg0, %c1_i32 : i32
    %1 = arith.addi %0, %arg1 : i32
    %c0_i32 = arith.constant 0 : i32
    %c0_i32_0 = arith.constant 0 : i32
    return %1, %c0_i32 : i32, i32
  }
  func.func @transform_1(%arg0: i32, %arg1: i32) -> (i32, i32, i32) {
    %c0_i32 = arith.constant 0 : i32
    %c0_i32_0 = arith.constant 0 : i32
    %c0_i32_1 = arith.constant 0 : i32
    return %arg0, %c0_i32, %c0_i32_0 : i32, i32, i32
  }
}

</mosaic_0001>

<bundles_post_ra>
// kernel: tpu_custom_call.1
= control target key start
LH: loop header
LB: loop body
LE: loop exit
PB: predicated region body
PF: predicated region fallthrough
CT: control target
= control target key end

     0   :  { %vm46_vm0 = vcmask 31744   ;;  %s497_s0 = inlined_call_operand.vmem [shape: f32[8,4], index: 0, kind: input, shape index: {}]   ;;  %s498_s1 = inlined_call_operand.hbm [shape: f32[1,4,4], index: 1, kind: output, shape index: {}]  }
   0x1   :  { %v45_v0 = vld [vmem:[%s497_s0] sm:$0xff] }
   0x2   :  { %6 = vsyncpa [#allocation4], 0  ;;  %v47_v1 = vsel %vm46_vm0, %v45_v0, -inf  ;;  %v476_v7 = vmov 0.0   ;;  %vm33_vm1 = vcmask 24576   ;;  %vm477_vm2 = vmmov 0  }
   0x3   :  { %48 = vmax.xlane.f32.xlu0 %v47_v1  ;;  %439 = vmatprep.subr.bf16.mxu1 %v476_v7  ;;  %34 = vst.msk [vmem:[#allocation2] sm:$0x1] %vm33_vm1, %v476_v7  ;;  %v478_v9 = vmov 1966171168   ;;  %v67_v11 = vlaneseq  ;;  %vm103_vm3 = vcmask 1040384   ;;  %vm216_vm4 = vcmask 31751  }
   0x4   :  { %433 = vmatprep.subr.bf16.mxu0 %v476_v7  ;;  %435 = vmatprep.mubr.msk.bf16.mxu0 %vm477_vm2, %v476_v7  ;;  %v65_v10 = vunpack.c.l.s4 %v478_v9  ;;  %vm170_vm5 = vcmask 1043456   ;;  %v479_v18 = vmov 0   ;;  %vm99_vm6 = vcmask 7168   ;;  %s480_s0 = smov [#allocation3]  }
   0x5   :  { %441 = vmatprep.mubr.msk.bf16.mxu1 %vm477_vm2, %v476_v7  ;;  %v68_v13 = vshrl.u32 %v67_v11, 7  ;;  %v105_v19 = vsel %vm103_vm3, 65535, %v479_v18  ;;  %vm166_vm7 = vcmask 64512   ;;  %vm31_vm8 = vcmask 27648   ;;  %s411_s8 = sshll.u32 %s480_s0, 4  ;;  %s412_s8 = int_to_ptr.vmem [resolvable:$true] %s411_s8 }
   0x6   :  { %v66_v12 = vunpack.c.0.s8 %v65_v10  ;;  %32 = vst.msk [vmem:[#allocation3] sm:$0xf] %vm31_vm8, %v476_v7  ;;  %s454_s9 = scalar_lea.vmem %s412_s8, 64  ;;  %p459_p1 = scmp.lt.s32.totalorder %s412_s8, %s412_s8 }
   0x7   :  { %p455_p0 = scmp.ne.s32.totalorder %s412_s8, %s454_s9  ;;  %p460_p2 = scmp.lt.s32.totalorder %s454_s9, %s454_s9 }
   0x8   :  { %v69_v17 = vsub.s32 %v66_v12, %v68_v13 }
   0x9   :  { %p461_p3 = por %p460_p2, %p459_p1 }
   0xa   :  { %v61_v15 = vld [vmem:[#allocation2] sm:$0x1] }
   0xb   :  { %p462_p4 = pnand %p461_p3, %p455_p0 }
   0xd   :  { %v149_v37 = vld [vmem:[#allocation3] sm:$0xf] }
  0x8c   :  { %v49_v2 = vpop.xlane.xlu0 %48 }
  0x8d   :  { %v50_v3 = vsub.f32 %v45_v0, %v49_v2 }
  0x8f   :  { %v51_v4 = vmul.f32 1.442695, %v50_v3 }
  0x91   :  { %450 = vpow2.f32 %v51_v4 }
  0x9e   :  { %v451_v5 = vpop.eup %450 }
  0x9f   :  { %v53_v6 = vsel %vm46_vm0, %v451_v5, 0.0 }
  0xa0   :  { %54 = vadd.xlane.f32.xlu0 %v53_v6 }
 0x129   :  { %v55_v8 = vpop.xlane.xlu0 %54 }
 0x12a   :  { %452 = vrcp.f32 %v55_v8 }
 0x137   :  { %v453_v14 = vpop.eup %452 }
 0x138   :  { %v57_v16 = vmul.f32 %v453_v14, %v451_v5 }
 0x13a   :  { %v60_v20 = vpack.c.bf16 %v57_v16, %v57_v16  ;;  %v63_v21 = vcombine.high %v57_v16, %v57_v16  ;;  %217 = vst.msk [vmem:[#allocation2 - $0x7] sm:$0x80] %vm216_vm4, %v57_v16  ;;  %v58_v30 = vrot.slane %v57_v16, 7 }
 0x13c   :  { %v171_v22 = vsel %vm170_vm5, %v60_v20, 0  ;;  %v107_v23 = vand.u32 %v105_v19, %v60_v20  ;;  %v70_v24 = vrot.slane %v63_v21, %v69_v17  ;;  %v59_v31 = vpack.c.bf16 %v58_v30, %v58_v30 }
 0x13d   :  { %440 = vmatpush3.bf16.msra.mxu1 %v171_v22 }
 0x13e   :  { %434 = vmatpush3.bf16.msra.mxu0 %v107_v23  ;;  %v71_v25 = vcombine.high %v70_v24, %v70_v24 }
 0x140   :  { %v78_v26 = vrot.slane %v71_v25, %v69_v17 }
 0x142   :  { %v79_v27 = vcombine.high %v78_v26, %v78_v26 }
 0x144   :  { %v81_v28 = vsub.f32 %v61_v15, %v79_v27 }
 0x146   :  { %v82_v29 = vpack.c.bf16 %v81_v28, %v81_v28 }
 0x148   :  { %83 = vxpose.xlu1.c.b16.start.end [1/1] (short) (narrow) %v82_v29, 16 }
 0x14c   :  { %150 = vxpose.xlu1.c.b16.start.end [1/1] (short) (narrow) %v59_v31, 16 }
 0x1aa   :  { %v91_v32 = vpop.trf.xlu1 }
 0x1ab   :  { %436 = vmatmul.mubr.msk.bf16.vlgmr.msra.gmra.mxu0 %vm99_vm6, %v91_v32 }
 0x1ae   :  { %v158_v33 = vpop.trf.xlu1 }
 0x1af   :  { %442 = vmatmul.mubr.msk.bf16.vlgmr.msra.gmra.mxu1 %vm166_vm7, %v158_v33 }
 0x26b   :  { %v143_v34 = vpop.f32.mrf.mxu0 }
 0x26d   :  { %v437_v35 = vpop.f32.mrf.mxu0 }
 0x26f   :  { %v146_v36 = vpop.f32.mrf.mxu0  ;;  %v207_v38 = vpop.f32.mrf.mxu1 }
 0x270   :  { %v208_v39 = vadd.f32 %v207_v38, %v143_v34 }
 0x271   :  { %v438_v40 = vpop.f32.mrf.mxu0  ;;  %v443_v41 = vpop.f32.mrf.mxu1 }
 0x272   :  { %v213_v42 = vadd.f32 %v208_v39, %v149_v37 }
 0x273   :  { %v210_v43 = vpop.f32.mrf.mxu1 }
 0x274   :  { %215 = vst.msk [vmem:[#allocation3] sm:$0xf] %vm31_vm8, %v213_v42 }
 0x275   :  { %v444_v44 = vpop.f32.mrf.mxu1 }
 0x276   :  { %465 = shalt.err (!%p462_p4)
}
 0x277   :  { %414 = dma.vmem_to_hbm [thread:$0]  %s412_s8, 64, %s498_s1, [#allocation4]  }
 0x278   :  { %474 = dma.done.wait [#allocation4], 64  }
 0x279   :  { %475 = vsyncadd [#allocation4], 4294967232 }
 0x27a   :  { %418 = vsyncpa [#allocation4], 1 }

</bundles_post_ra>
